<compile_context>
chip_gen: v5e
topology: v5e:2x2
jax: 0.10.0
libtpu: 0.0.40
codegen_flags: <defaults>
</compile_context>

<pallas_src>
import functools
import math

import jax
import jax.numpy as jnp
from jax.experimental import pallas as pl
from jax.experimental.pallas import tpu as pltpu


def intensity_kernel(noise_ref, x_ref, o_ref, *, compute_dtype):
    """noise_ref: (TB, 1) f32 VMEM; x_ref / o_ref: (TB, TC) VMEM."""
    n = noise_ref[...].astype(compute_dtype)                       # (TB, 1)
    o_ref[...] = (x_ref[...].astype(compute_dtype) * n).astype(o_ref.dtype)


def _device_tuning():
    """Generation-aware block / VMEM limits.  Conservative fallback."""
    try:
        kind = jax.devices()[0].device_kind.lower()
    except Exception:  # pragma: no cover - defensive
        kind = ""
    if "v7" in kind:
        # 64 MiB VMEM, ~3.2 TB/s HBM: bigger tiles, but leave VMEM headroom.
        return dict(max_block_bytes=8 * 1024 * 1024,
                    vmem_limit_bytes=48 * 1024 * 1024,
                    low_precision_compute=True)
    if "v6" in kind:
        return dict(max_block_bytes=4 * 1024 * 1024,
                    vmem_limit_bytes=32 * 1024 * 1024,
                    low_precision_compute=True)
    # v5e (and unknown): 4 MiB tiles already put the kernel near roofline;
    # scoped-VMEM default is 16 MiB so the 32 MiB override is required.
    return dict(max_block_bytes=4 * 1024 * 1024,
                vmem_limit_bytes=32 * 1024 * 1024,
                low_precision_compute=False)


def _choose_tiles(B, inner, itemsize, cap_bytes, sub):
    """Pick (tb, tc): lane-dense, <= cap_bytes per data block (including the
    lane-padded noise row), satisfying the (8,128)-or-full-extent rule."""
    LANE = 128
    noise_row = LANE * 4                          # lane-padded f32 noise row
    row_bytes = inner * itemsize + noise_row
    min_rows = B if B < sub else sub              # smallest legal row block
    if min_rows * row_bytes <= cap_bytes:
        # Whole flattened rows fit: take as many rows as the budget allows.
        tc = inner
        rows = cap_bytes // row_bytes
        tb = B if rows >= B else max(sub, (rows // sub) * sub)
        tb = min(tb, B)
        return tb, tc
    # Rows too large for the budget: tile columns as well.
    tb = min(B, sub)
    tc = max(LANE, (cap_bytes // (tb * itemsize)) // LANE * LANE)
    tc = min(tc, inner)
    return tb, tc


def _split_for_two_cores(B, inner, tb, tc, sub):
    """Never emit a grid=(1,1) launch: halve one axis so both v7x TensorCores
    get work (no effect on 1-TC chips beyond a negligible extra grid step)."""
    LANE = 128
    if pl.cdiv(B, tb) * pl.cdiv(inner, tc) >= 2:
        return tb, tc
    if B >= 2 * sub:
        tb2 = (((B + 1) // 2) + sub - 1) // sub * sub
        if tb2 < B:
            return tb2, tc
    if inner >= 2 * LANE:
        tc2 = (((inner + 1) // 2) + LANE - 1) // LANE * LANE
        if tc2 < inner:
            return tb, tc2
    return tb, tc  # too small to matter


def intensity(x, r, *, scale=0.05, max_block_bytes=None, vmem_limit_bytes=None):
    """x: (B, *spatial); r: (B,) gaussian draws (stand-in for torch.randn)."""
    tune = _device_tuning()
    if max_block_bytes is None:
        max_block_bytes = tune["max_block_bytes"]
    if vmem_limit_bytes is None:
        vmem_limit_bytes = tune["vmem_limit_bytes"]

    B = x.shape[0]
    inner = math.prod(x.shape[1:]) if x.ndim > 1 else 1
    itemsize = jnp.dtype(x.dtype).itemsize
    sub = max(8, 8 * (4 // max(1, itemsize)))     # 8 f32 / 16 bf16 / 32 int8

    # Precompute noise once in the wrapper; kernel is then a pure multiply.
    noise = 1.0 + scale * jnp.clip(jnp.reshape(r, (B,)).astype(jnp.float32),
                                   -2.0, 2.0)

    x2 = x.reshape(B, inner)
    # Fold a single huge row onto the sublanes when it divides cleanly.
    if B == 1 and inner % (sub * 128) == 0 and inner // sub >= 128:
        B2, inner2 = sub, inner // sub
        x2 = x2.reshape(B2, inner2)
        noise2 = jnp.broadcast_to(noise, (B2,)).reshape(B2, 1)
    else:
        B2, inner2 = B, inner
        noise2 = noise.reshape(B2, 1)

    tb, tc = _choose_tiles(B2, inner2, itemsize, max_block_bytes, sub)
    tb, tc = _split_for_two_cores(B2, inner2, tb, tc, sub)
    grid = (pl.cdiv(B2, tb), pl.cdiv(inner2, tc))

    low_prec = (tune["low_precision_compute"]
                and itemsize == 2
                and jnp.issubdtype(x.dtype, jnp.floating))
    compute_dtype = x.dtype if low_prec else jnp.float32

    kernel = functools.partial(intensity_kernel, compute_dtype=compute_dtype)
    cost = pl.CostEstimate(
        flops=int(B2) * int(inner2),
        transcendentals=0,
        bytes_accessed=2 * int(B2) * int(inner2) * int(itemsize) + int(B2) * 4,
    )

    out2 = pl.pallas_call(
        kernel,
        out_shape=jax.ShapeDtypeStruct((B2, inner2), x2.dtype),
        grid_spec=pl.GridSpec(
            grid=grid,
            in_specs=[
                pl.BlockSpec((tb, 1), lambda i, j: (i, 0)),    # per-row noise
                pl.BlockSpec((tb, tc), lambda i, j: (i, j)),   # data tile
            ],
            out_specs=pl.BlockSpec((tb, tc), lambda i, j: (i, j)),
        ),
        compiler_params=pltpu.CompilerParams(
            dimension_semantics=("parallel", "parallel"),
            vmem_limit_bytes=vmem_limit_bytes,
        ),
        cost_estimate=cost,
    )(noise2, x2)
    return out2.reshape(x.shape)


if __name__ == "__main__":
    key = jax.random.PRNGKey(0)
    kx1, kr1, kx2, kr2, kx3, kr3 = jax.random.split(key, 6)
    scale = 0.05

    def ref_fn(x, r, scale):
        noise = 1.0 + scale * jnp.clip(r.astype(jnp.float32), -2.0, 2.0)
        noise = noise.reshape((x.shape[0],) + (1,) * (x.ndim - 1))
        return (x.astype(jnp.float32) * noise).astype(x.dtype)

    # Case 1: f32 multi-batch (mirrors the torch module's (B, H, W) usage).
    x1 = jax.random.normal(kx1, (4, 16, 128), dtype=jnp.float32)
    r1 = jax.random.normal(kr1, (4,), dtype=jnp.float32)
    o1 = jax.block_until_ready(intensity(x1, r1, scale=scale))
    assert o1.shape == x1.shape and o1.dtype == x1.dtype
    assert jnp.allclose(o1, ref_fn(x1, r1, scale), atol=1e-6, rtol=1e-6)

    # Case 2: bf16 (dtype-aware sublane rounding + low-precision compute path).
    # TODO(synk): PyTorch promotes bf16 * f32 to f32; we keep x.dtype here.
    x2 = jax.random.normal(kx2, (8, 8, 256), dtype=jnp.bfloat16)
    r2 = jax.random.normal(kr2, (8,), dtype=jnp.float32)
    o2 = jax.block_until_ready(intensity(x2, r2, scale=scale))
    assert o2.shape == x2.shape and o2.dtype == x2.dtype
    assert jnp.allclose(o2.astype(jnp.float32),
                        ref_fn(x2, r2, scale).astype(jnp.float32),
                        atol=2e-2, rtol=2e-2)

    # Case 3: single-batch row folded onto the sublanes.
    x3 = jax.random.normal(kx3, (1, 8, 1024), dtype=jnp.float32)
    r3 = jax.random.normal(kr3, (1,), dtype=jnp.float32)
    o3 = jax.block_until_ready(intensity(x3, r3, scale=scale))
    assert o3.shape == x3.shape and o3.dtype == x3.dtype
    assert jnp.allclose(o3, ref_fn(x3, r3, scale), atol=1e-6, rtol=1e-6)

    print("KERNEL_OK")
</pallas_src>

<mosaic_0001>
module attributes {stable_mosaic.version = 11 : i64} {
  func.func @intensity_kernel(%arg0: i32, %arg1: i32, %arg2: memref<4x1xf32, #tpu.memory_space<vmem>>, %arg3: memref<4x1024xf32, #tpu.memory_space<vmem>>, %arg4: memref<4x1024xf32, #tpu.memory_space<vmem>>) attributes {dimension_semantics = [#tpu.dimension_semantics<parallel>, #tpu.dimension_semantics<parallel>], iteration_bounds = array<i64: 1, 2>, scalar_prefetch = 0 : i64, scratch_operands = 0 : i64, tpu.core_type = #tpu.core_type<tc>, window_params = [{transform_indices = @transform_0, window_bounds = array<i64: 4, 1>}, {transform_indices = @transform_1, window_bounds = array<i64: 4, 1024>}, {transform_indices = @transform_2, window_bounds = array<i64: 4, 1024>}]} {
    %c0 = arith.constant 0 : index
    %c0_0 = arith.constant 0 : index
    %0 = vector.load %arg2[%c0, %c0_0] : memref<4x1xf32, #tpu.memory_space<vmem>>, vector<4x1xf32>
    %c0_1 = arith.constant 0 : index
    %c0_2 = arith.constant 0 : index
    %1 = vector.load %arg3[%c0_1, %c0_2] : memref<4x1024xf32, #tpu.memory_space<vmem>>, vector<4x1024xf32>
    %2 = vector.broadcast %0 : vector<4x1xf32> to vector<4x1024xf32>
    %3 = arith.mulf %1, %2 : vector<4x1024xf32>
    %c0_3 = arith.constant 0 : index
    %c0_4 = arith.constant 0 : index
    %4 = vector.load %arg4[%c0_3, %c0_4] : memref<4x1024xf32, #tpu.memory_space<vmem>>, vector<4x1024xf32>
    tpu.vector_store %arg4[%c0_3, %c0_4], %3 {strides = array<i32>} : memref<4x1024xf32, #tpu.memory_space<vmem>>, vector<4x1024xf32>,
    return
  }
  func.func @transform_0(%arg0: i32, %arg1: i32) -> (i32, i32) {
    %c0_i32 = arith.constant 0 : i32
    %c0_i32_0 = arith.constant 0 : i32
    return %arg0, %c0_i32 : i32, i32
  }
  func.func @transform_1(%arg0: i32, %arg1: i32) -> (i32, i32) {
    %c0_i32 = arith.constant 0 : i32
    return %arg0, %arg1 : i32, i32
  }
  func.func @transform_2(%arg0: i32, %arg1: i32) -> (i32, i32) {
    %c0_i32 = arith.constant 0 : i32
    return %arg0, %arg1 : i32, i32
  }
}

</mosaic_0001>

<bundles_post_ra>
// kernel: tpu_custom_call.1
= control target key start
LH: loop header
LB: loop body
LE: loop exit
PB: predicated region body
PF: predicated region fallthrough
CT: control target
= control target key end

     0   :  { %7 = vsyncpa [#allocation3], 0  ;;  %s676_s0 = inlined_call_operand.vmem [shape: f32[4,1], index: 0, kind: input, shape index: {}]   ;;  %s677_s1 = inlined_call_operand.hbm [shape: f32[4,2048], index: 1, kind: input, shape index: {}]   ;;  %s678_s2 = inlined_call_operand.hbm [shape: f32[4,2048], index: 2, kind: output, shape index: {}]  }
   0x1   :  { %9 = vsyncpa [#allocation3 + $0x1], 0 }
   0x2   :  { %10 = vsyncpa [#allocation4], 0 }
   0x3   :  { %12 = vsyncpa [#allocation4 + $0x1], 0  ;;  %s553_s9 = smov 0   ;;  %s555_s10 = smov 0  }
   0x4   :  { %s557_s11 = smov 0   ;;  %s559_s12 = smov 0  }
   0x5   :  { %s561_s13 = smov 0   ;;  %s563_s14 = smov 0  }
   0x6 LB: > { %s339_s15 = sadd.s32 4294967295, %s534_s14   ;;  %s340_s16 = sadd.s32 4294967294, %s534_s14   ;;  %s534_s14 = sphi %s563_s14, %s18_s14   ;;  %s530_s13 = sphi %s561_s13, %s687_s13   ;;  %s526_s12 = sphi %s559_s12, %s686_s12   ;;  %s522_s11 = sphi %s557_s11, %s685_s11   ;;  %s518_s10 = sphi %s555_s10, %s684_s10   ;;  %s514_s9 = sphi %s553_s9, %s683_s9  }
   0x7   : > { %s27_s17 = sadd.s32 1, %s530_s13  ;;  %s65_s18 = sadd.s32 1, %s522_s11 }
   0x8   : > { %p28_p0 = scmp.ge.s32.totalorder %s27_s17, 2  ;;  %p72_p1 = scmp.ne.s32.totalorder %s522_s11, %s518_s10 }
   0x9   : > { %p73_p2 = scmp.eq.s32.totalorder %s534_s14, 0  ;;  %p78_p3 = scmp.ne.s32.totalorder %s518_s10, %s514_s9 }
   0xa   : > { %s689_s17 = smov (%p28_p0, %s27_s17), 0  ;;  %p79_p5 = scmp.eq.s32.totalorder %s339_s15, 0 }
   0xb   : > { %p594_p4 = por %p73_p2, %p72_p1  ;;  %s61_s20 = ssub.s32 %s530_s13, %s689_s17 }
   0xc   : > { %p104_p6 = scmp.eq.s32.totalorder %s339_s15, 1  ;;  %p63_p7 = scmp.eq.s32.totalorder %s61_s20, 0 }
   0xd   : > { %p600_p8 = por %p79_p5, %p78_p3  ;;  %p110_p10 = scmp.eq.s32.totalorder %s340_s16, 1 }
   0xe   : > { %p604_p9 = por %p104_p6, %p72_p1  ;;  %p343_p12 = scmp.ge.s32.totalorder %s534_s14, 2 }
   0xf   : > { %s609_s23 = scalar_select %p63_p7, %s522_s11, %s65_s18  }
  0x10   : > { %p611_p11 = por %p110_p10, %p78_p3  ;;  %p369_p13 = scmp.lt.s32.totalorder %s534_s14, 2 }
  0x11   : > { %s137_s25 = sand.u32 1, %s522_s11   ;;  %s355_s27 = sshll.u32 %s530_s13, 5 }
  0x12   : > { %s344_s26 = sshll.u32 %s137_s25, 5  ;;  %s148_s30 = scalar_lea.hbm %s677_s1, %s355_s27 }
  0x13   : > { %s141_s3 = scalar_lea.vmem [#allocation2], %s344_s26  ;;  %s150_s5 = sshll.u32 %s148_s30, 4  ;;  %s151_s5 = int_to_ptr.hbm [resolvable:$true] %s150_s5 }
  0x14   : > { %s152_s4 = sshll.u32 %s141_s3, 4  ;;  %p362_p0 = pnand %p369_p13, %p594_p4  ;;  %s153_s4 = int_to_ptr.vmem [resolvable:$true] %s152_s4 }
  0x15   : > { %p347_p1 = scmp.ge.s32.totalorder %s534_s14, 1  ;;  %p157_p2 = scmp.lt.s32.totalorder %s534_s14, 3 }
  0x16   : > { %s138_s6 = scalar_lea.sflag [#allocation3], %s137_s25 }
  0x17   : > { %364 = dma.hbm_to_vmem [thread:$0]  (!%p362_p0), %s151_s5, 512, %s153_s4, %s138_s6  }
  0x18   : > { %p158_p3 = pnand %p347_p1, %p157_p2 }
  0x19   : > { %s627_s7 = sand.u32 (!%p158_p3), 1, %s518_s10  }
  0x1a   : > { %161 = sbr.rel (%p158_p3) target bundleno = 159 (0x9f), region = 28  ;;  %s348_s8 = sshll.u32 (!%p158_p3), %s627_s7, 5 }
  0x1b   : > { %s164_s15 = scalar_lea.sflag (!%p158_p3), [#allocation3], %s627_s7  ;;  %s167_s16 = scalar_lea.vmem (!%p158_p3), [#allocation2], %s348_s8 }
  0x1f   : > { %505 = dma.done.wait (%p600_p8), %s164_s15, 512  }
  0x20   : > { %507 = vsyncadd (%p600_p8), %s164_s15, 4294966784  ;;  %v536_v0 = vmov 0   ;;  %v199_v1 = vld [vmem:[%s676_s0] sm:$0xf]  ;;  %v537_v2 = vmov 839922192  }
  0x21   : > { %421 = vset.pattern.permute.xlu0 %v536_v0  ;;  %v209_v3 = vunpack.c.l.s4 %v537_v2  ;;  %s356_s20 = sshll.u32 %s526_s12, 5  ;;  %v200_v5 = vld [vmem:[%s167_s16] sm:$0xff]  ;;  %v201_v6 = vld [vmem:[%s167_s16 + $0x8] sm:$0xff]  ;;  %v202_v7 = vld [vmem:[%s167_s16 + $0x10] sm:$0xff]  ;;  %s192_s27 = scalar_lea.vmem [#allocation5], %s348_s8 }
  0x22   : > { %206 = vperm.xlu0 %421, %v199_v1   ;;  %s235_s21 = scalar_lea.hbm %s678_s2, %s356_s20  ;;  %v203_v9 = vld [vmem:[%s167_s16 + $0x18] sm:$0xff]  ;;  %s237_s28 = sshll.u32 %s192_s27, 4  ;;  %s238_s28 = int_to_ptr.vmem [resolvable:$true] %s237_s28 }
  0x23   : > { %v210_v4 = vunpack.c.0.s8 %v209_v3  ;;  %s239_s29 = sshll.u32 %s235_s21, 4  ;;  %s222_s12 = scalar_lea.sflag [#allocation4], %s627_s7  ;;  %s240_s29 = int_to_ptr.hbm [resolvable:$true] %s239_s29 }
  0x24   : > { %s466_s30 = sshra.s32 %s240_s29, 4  ;;  %s472_s6 = scalar_lea.hbm %s678_s2, 64  ;;  %s467_s30 = int_to_ptr.hbm [resolvable:$true] %s466_s30 }
  0x25   : > { %s468_s3 = scalar_lea.hbm %s467_s30, 32  ;;  %p473_p7 = scmp.lt.s32.totalorder %s467_s30, %s678_s2 }
  0x26   : > { %p469_p4 = scmp.ne.s32.totalorder %s467_s30, %s468_s3  ;;  %p474_p8 = scmp.lt.s32.totalorder %s472_s6, %s468_s3 }
  0x28   : > { %p470_p5 = pnand %p469_p4, %p604_p9  ;;  %p475_p10 = por %p474_p8, %p473_p7 }
  0x2a   : > { %p471_p6 = pneg %p470_p5 }
  0x2c   : > { %p476_p13 = pnand %p475_p10, %p471_p6 }
  0x94   : > { %v207_v8 = vpop.permute.xlu0 %206 }
  0x95   : > { %v211_v10 = vperm.slane %v207_v8, %v210_v4 }
  0x97   : > { %v213_v11 = vmul.f32 %v211_v10, %v200_v5  ;;  %v214_v12 = vmul.f32 %v211_v10, %v201_v6  ;;  %v215_v13 = vmul.f32 %v211_v10, %v202_v7  ;;  %v216_v14 = vmul.f32 %v211_v10, %v203_v9 }
  0x99   : > { %217 = vst [vmem:[%s192_s27] sm:$0xff] %v213_v11 }
  0x9a   : > { %218 = vst [vmem:[%s192_s27 + $0x8] sm:$0xff] %v214_v12 }
  0x9b   : > { %219 = vst [vmem:[%s192_s27 + $0x10] sm:$0xff] %v215_v13 }
  0x9c   : > { %220 = vst [vmem:[%s192_s27 + $0x18] sm:$0xff] %v216_v14 }
  0x9d   : > { %479 = shalt.err (!%p476_p13)
}
  0x9e   : > { %359 = dma.vmem_to_hbm [thread:$0]  (%p604_p9), %s238_s28, 512, %s240_s29, %s222_s12  }
  0x9f PF: > { %s251_s7 = sand.u32 1, %s514_s9   ;;  %p366_p0 = pnand %p343_p12, %p611_p11 }
  0xa0   : > { %s252_s16 = scalar_lea.sflag [#allocation4], %s251_s7 }
  0xa1   : > { %p367_p1 = pneg %p366_p0 }
  0xa3   : > { %509 = dma.done.wait (%p367_p1), %s252_s16, 512  }
  0xa4   : > { %511 = vsyncadd (%p367_p1), %s252_s16, 4294966784  ;;  %s18_s14 = sadd.s32 1, %s534_s14   ;;  %s683_s9 = smov %s518_s10 }
  0xa5   : > { %p15_p2 = scmp.ge.s32.totalorder %s18_s14, 4   ;;  %s684_s10 = smov %s522_s11 }
  0xa6   : > { %s685_s11 = smov %s609_s23  ;;  %s686_s12 = smov %s530_s13 }
  0xa7   : > { %s687_s13 = smov %s689_s17  ;;  %17 = sbr.rel (!%p15_p2) target bundleno = 6 (0x6), region = 76 }
  0xac   :  { %258 = vsyncpa [#allocation3], 1 }
  0xad   :  { %260 = vsyncpa [#allocation3 + $0x1], 1 }
  0xae   :  { %261 = vsyncpa [#allocation4], 1 }
  0xaf   :  { %263 = vsyncpa [#allocation4 + $0x1], 1 }

</bundles_post_ra>
